<compile_context>
chip_gen: v7x
topology: tpu7x:2x2x1
jax: 0.10.0
libtpu: 0.0.40
codegen_flags: <defaults>
</compile_context>

<pallas_src>
import functools
import math

import jax
import jax.numpy as jnp
from jax.experimental import pallas as pl
from jax.experimental.pallas import tpu as pltpu


def _normalize_rows(x, eps=1e-12):
    # F.normalize(x, p=2, dim=1): x / max(||x||_2, eps)
    norm = jnp.sqrt(jnp.sum(x * x, axis=1, keepdims=True))
    return x / jnp.maximum(norm, eps)


def _arc_margin_kernel(x_ref, w_ref, lbl_ref, out_ref, *, s, cos_m, sin_m, c_block):
    x = x_ref[...].astype(jnp.float32)            # (tb, K)
    w = w_ref[...].astype(jnp.float32)            # (tc, K)
    lbl = lbl_ref[...]                            # (tb, 1) int32

    xn = _normalize_rows(x)
    wn = _normalize_rows(w)

    # cosine = xn @ wn.T  (contract feature dim of both operands -> MXU)
    cos = jax.lax.dot_general(
        xn, wn, (((1,), (1,)), ((), ())), preferred_element_type=jnp.float32)

    # sqrt clamped at 0: identical to torch wherever cos^2 <= 1, avoids NaN
    # when rounding pushes cos^2 slightly above 1.
    sin = jnp.sqrt(jnp.maximum(1.0 - cos * cos, 0.0))
    phi = cos * cos_m - sin * sin_m

    # one_hot.scatter_(1, label, 1) -> compare global class index to label.
    col = jax.lax.broadcasted_iota(jnp.int32, cos.shape, 1) + pl.program_id(1) * c_block
    mask = col == lbl                             # (tb, tc) bool

    out_ref[...] = (jnp.where(mask, phi, cos) * s).astype(out_ref.dtype)


def _cosine_kernel(x_ref, w_ref, out_ref, *, s):
    # label is None path: just scaled cosine similarity.
    xn = _normalize_rows(x_ref[...].astype(jnp.float32))
    wn = _normalize_rows(w_ref[...].astype(jnp.float32))
    cos = jax.lax.dot_general(
        xn, wn, (((1,), (1,)), ((), ())), preferred_element_type=jnp.float32)
    out_ref[...] = (cos * s).astype(out_ref.dtype)


def _pick_block(dim, preferred):
    """Largest tile from `preferred` that divides `dim`; else the full dim."""
    for p in preferred:
        if p <= dim and dim % p == 0:
            return p
    return dim


def arc_margin_product(x, weight, label=None, *, s=30.0, m=0.5):
    """Pallas TPU implementation of ArcMarginProduct.forward(input, label)."""
    B, K = x.shape
    C, K2 = weight.shape
    assert K == K2, (x.shape, weight.shape)

    # Batch tiles: multiples of 8 (sublanes). Class tiles: prefer multiples of
    # 128 (lane-dense output stores); tiles are sized to stay well inside the
    # scoped VMEM of every TPU generation (v7x's 64 MiB included).
    tb = _pick_block(B, (256, 128, 64, 32, 16, 8))
    tc = _pick_block(C, (1024, 512, 256, 128))
    grid = (B // tb, C // tc)

    out_shape = jax.ShapeDtypeStruct((B, C), x.dtype)
    compiler_params = pltpu.CompilerParams(
        dimension_semantics=("parallel", "parallel"))

    if label is None:
        kernel = functools.partial(_cosine_kernel, s=float(s))
        return pl.pallas_call(
            kernel,
            out_shape=out_shape,
            grid=grid,
            in_specs=[
                pl.BlockSpec((tb, K), lambda i, j: (i, 0)),
                pl.BlockSpec((tc, K), lambda i, j: (j, 0)),
            ],
            out_specs=pl.BlockSpec((tb, tc), lambda i, j: (i, j)),
            compiler_params=compiler_params,
        )(x, weight)

    lbl = label.reshape(B, 1).astype(jnp.int32)
    kernel = functools.partial(
        _arc_margin_kernel,
        s=float(s), cos_m=math.cos(m), sin_m=math.sin(m), c_block=tc)
    return pl.pallas_call(
        kernel,
        out_shape=out_shape,
        grid=grid,
        in_specs=[
            pl.BlockSpec((tb, K), lambda i, j: (i, 0)),   # input batch tile
            pl.BlockSpec((tc, K), lambda i, j: (j, 0)),   # weight class tile
            pl.BlockSpec((tb, 1), lambda i, j: (i, 0)),   # labels: same block for all class tiles
        ],
        out_specs=pl.BlockSpec((tb, tc), lambda i, j: (i, j)),
        compiler_params=compiler_params,
    )(x, weight, lbl)


def arc_margin_product_ref(x, weight, label=None, *, s=30.0, m=0.5):
    """Pure-JAX reference mirroring the PyTorch forward, for correctness checking."""
    xn = _normalize_rows(x)
    wn = _normalize_rows(weight)
    cosine = jnp.dot(xn, wn.T, precision=jax.lax.Precision.HIGHEST)
    if label is None:
        return cosine * s
    sine = jnp.sqrt(jnp.maximum(1.0 - cosine * cosine, 0.0))
    phi = cosine * math.cos(m) - sine * math.sin(m)
    one_hot = jax.nn.one_hot(label, cosine.shape[1], dtype=cosine.dtype)
    return jnp.where(one_hot > 0, phi, cosine) * s


if __name__ == "__main__":
    key = jax.random.PRNGKey(0)
    kx, kw, kl = jax.random.split(key, 3)

    B, in_features, out_features = 8, 32, 64
    s, m = 30.0, 0.5

    # xavier_uniform-style weight init, standard-normal features.
    limit = math.sqrt(6.0 / (in_features + out_features))
    x = jax.random.normal(kx, (B, in_features), jnp.float32)
    weight = jax.random.uniform(
        kw, (out_features, in_features), jnp.float32, minval=-limit, maxval=limit)
    label = jax.random.randint(kl, (B,), 0, out_features, dtype=jnp.int32)

    # Labelled path (training head).
    out = arc_margin_product(x, weight, label, s=s, m=m)
    jax.block_until_ready(out)
    ref = arc_margin_product_ref(x, weight, label, s=s, m=m)
    assert out.shape == (B, out_features)
    assert jnp.allclose(out, ref, rtol=5e-3, atol=5e-2), float(jnp.max(jnp.abs(out - ref)))

    # label == None path (inference: plain scaled cosine).
    out_nl = arc_margin_product(x, weight, None, s=s, m=m)
    jax.block_until_ready(out_nl)
    ref_nl = arc_margin_product_ref(x, weight, None, s=s, m=m)
    assert jnp.allclose(out_nl, ref_nl, rtol=5e-3, atol=5e-2)

    print("KERNEL_OK")
</pallas_src>

<mosaic_0001>
module attributes {stable_mosaic.version = 11 : i64} {
  func.func @_arc_margin_kernel(%arg0: i32, %arg1: i32, %arg2: memref<8x32xf32, #tpu.memory_space<vmem>>, %arg3: memref<64x32xf32, #tpu.memory_space<vmem>>, %arg4: memref<8x1xi32, #tpu.memory_space<vmem>>, %arg5: memref<8x64xf32, #tpu.memory_space<vmem>>) attributes {dimension_semantics = [#tpu.dimension_semantics<parallel>, #tpu.dimension_semantics<parallel>], iteration_bounds = array<i64: 1, 1>, scalar_prefetch = 0 : i64, scratch_operands = 0 : i64, tpu.core_type = #tpu.core_type<tc>, window_params = [{transform_indices = @transform_0, window_bounds = array<i64: 8, 32>}, {transform_indices = @transform_1, window_bounds = array<i64: 64, 32>}, {transform_indices = @transform_2, window_bounds = array<i64: 8, 1>}, {transform_indices = @transform_3, window_bounds = array<i64: 8, 64>}]} {
    %c0 = arith.constant 0 : index
    %c0_0 = arith.constant 0 : index
    %0 = vector.load %arg2[%c0, %c0_0] : memref<8x32xf32, #tpu.memory_space<vmem>>, vector<8x32xf32>
    %c0_1 = arith.constant 0 : index
    %c0_2 = arith.constant 0 : index
    %1 = vector.load %arg3[%c0_1, %c0_2] : memref<64x32xf32, #tpu.memory_space<vmem>>, vector<64x32xf32>
    %c0_3 = arith.constant 0 : index
    %c0_4 = arith.constant 0 : index
    %2 = vector.load %arg4[%c0_3, %c0_4] : memref<8x1xi32, #tpu.memory_space<vmem>>, vector<8x1xi32>
    %3 = arith.mulf %0, %0 : vector<8x32xf32>
    %cst = arith.constant dense<0.000000e+00> : vector<8xf32>
    %4 = vector.multi_reduction <add>, %3, %cst [1] : vector<8x32xf32> to vector<8xf32>
    %5 = vector.shape_cast %4 : vector<8xf32> to vector<8x1xf32>
    %6 = math.sqrt %5 : vector<8x1xf32>
    %cst_5 = arith.constant 9.99999996E-13 : f32
    %7 = vector.broadcast %cst_5 : f32 to vector<8x1xf32>
    %8 = arith.maximumf %6, %7 : vector<8x1xf32>
    %9 = vector.broadcast %8 : vector<8x1xf32> to vector<8x32xf32>
    %10 = arith.divf %0, %9 : vector<8x32xf32>
    %11 = arith.mulf %1, %1 : vector<64x32xf32>
    %cst_6 = arith.constant dense<0.000000e+00> : vector<64xf32>
    %12 = vector.multi_reduction <add>, %11, %cst_6 [1] : vector<64x32xf32> to vector<64xf32>
    %13 = vector.shape_cast %12 : vector<64xf32> to vector<64x1xf32>
    %14 = math.sqrt %13 : vector<64x1xf32>
    %cst_7 = arith.constant 9.99999996E-13 : f32
    %15 = vector.broadcast %cst_7 : f32 to vector<64x1xf32>
    %16 = arith.maximumf %14, %15 : vector<64x1xf32>
    %17 = vector.broadcast %16 : vector<64x1xf32> to vector<64x32xf32>
    %18 = arith.divf %1, %17 : vector<64x32xf32>
    %cst_8 = arith.constant dense<0.000000e+00> : vector<8x64xf32>
    %19 = tpu.matmul %10, %18, %cst_8 {dimension_numbers = #tpu.dot_dimension_numbers<[1], [1], [0], [0], [0, 0, 1, 0], [], []>} : vector<8x32xf32>, vector<64x32xf32>, vector<8x64xf32> -> vector<8x64xf32>
    %20 = arith.mulf %19, %19 : vector<8x64xf32>
    %cst_9 = arith.constant 1.000000e+00 : f32
    %21 = vector.broadcast %cst_9 : f32 to vector<8x64xf32>
    %22 = arith.subf %21, %20 : vector<8x64xf32>
    %cst_10 = arith.constant 0.000000e+00 : f32
    %23 = vector.broadcast %cst_10 : f32 to vector<8x64xf32>
    %24 = arith.maximumf %22, %23 : vector<8x64xf32>
    %25 = math.sqrt %24 : vector<8x64xf32>
    %cst_11 = arith.constant 0.87758255 : f32
    %26 = vector.broadcast %cst_11 : f32 to vector<8x64xf32>
    %27 = arith.mulf %19, %26 : vector<8x64xf32>
    %cst_12 = arith.constant 0.47942555 : f32
    %28 = vector.broadcast %cst_12 : f32 to vector<8x64xf32>
    %29 = arith.mulf %25, %28 : vector<8x64xf32>
    %30 = arith.subf %27, %29 : vector<8x64xf32>
    %31 = tpu.iota {dimensions = array<i32: 1>} : vector<8x64xi32>
    %c64_i32 = arith.constant 64 : i32
    %32 = arith.muli %arg1, %c64_i32 : i32
    %33 = vector.broadcast %32 : i32 to vector<8x64xi32>
    %34 = arith.addi %31, %33 : vector<8x64xi32>
    %35 = vector.broadcast %2 : vector<8x1xi32> to vector<8x64xi32>
    %36 = arith.cmpi eq, %34, %35 : vector<8x64xi32>
    %37 = arith.select %36, %30, %19 : vector<8x64xi1>, vector<8x64xf32>
    %cst_13 = arith.constant 3.000000e+01 : f32
    %38 = vector.broadcast %cst_13 : f32 to vector<8x64xf32>
    %39 = arith.mulf %37, %38 : vector<8x64xf32>
    %c0_14 = arith.constant 0 : index
    %c0_15 = arith.constant 0 : index
    %40 = vector.load %arg5[%c0_14, %c0_15] : memref<8x64xf32, #tpu.memory_space<vmem>>, vector<8x64xf32>
    tpu.vector_store %arg5[%c0_14, %c0_15], %39 {strides = array<i32>} : memref<8x64xf32, #tpu.memory_space<vmem>>, vector<8x64xf32>,
    return
  }
  func.func @transform_0(%arg0: i32, %arg1: i32) -> (i32, i32) {
    %c0_i32 = arith.constant 0 : i32
    %c0_i32_0 = arith.constant 0 : i32
    return %arg0, %c0_i32 : i32, i32
  }
  func.func @transform_1(%arg0: i32, %arg1: i32) -> (i32, i32) {
    %c0_i32 = arith.constant 0 : i32
    %c0_i32_0 = arith.constant 0 : i32
    return %arg1, %c0_i32 : i32, i32
  }
  func.func @transform_2(%arg0: i32, %arg1: i32) -> (i32, i32) {
    %c0_i32 = arith.constant 0 : i32
    %c0_i32_0 = arith.constant 0 : i32
    return %arg0, %c0_i32 : i32, i32
  }
  func.func @transform_3(%arg0: i32, %arg1: i32) -> (i32, i32) {
    %c0_i32 = arith.constant 0 : i32
    return %arg0, %arg1 : i32, i32
  }
}

</mosaic_0001>

<bundles_post_ra>
// kernel: tpu_custom_call.1
= control target key start
LH: loop header
LB: loop body
LE: loop exit
PB: predicated region body
PF: predicated region fallthrough
CT: control target
= control target key end

     0   :  { %vm26_vm0 = vcmask 261120   ;;  %s568_s0 = inlined_call_operand.vmem [shape: f32[8,32], index: 0, kind: input, shape index: {}]   ;;  %s569_s1 = inlined_call_operand.vmem [shape: f32[64,32], index: 1, kind: input, shape index: {}]   ;;  %s570_s2 = inlined_call_operand.vmem [shape: s32[8,1], index: 2, kind: input, shape index: {}]   ;;  %s571_s3 = inlined_call_operand.hbm [shape: f32[8,64], index: 3, kind: output, shape index: {}]  }
   0x1   :  { %v439_v0 = vld [vmem:[%s569_s1 + $0x10] sm:$0xff]  ;;  %v444_v1 = vld [vmem:[%s569_s1] sm:$0xff]  ;;  %v449_v2 = vld [vmem:[%s569_s1 + $0x18] sm:$0xff] }
   0x2   :  { %v42_v3 = vmul.f32 %v439_v0, %v439_v0  ;;  %v40_v4 = vmul.f32 %v444_v1, %v444_v1  ;;  %v43_v5 = vmul.f32 %v449_v2, %v449_v2  ;;  %v460_v6 = vld [vmem:[%s569_s1 + $0x8] sm:$0xff]  ;;  %v472_v9 = vld [vmem:[%s569_s1 + $0x20] sm:$0xff] }
   0x3   :  { %v41_v7 = vmul.f32 %v460_v6, %v460_v6  ;;  %v467_v8 = vld [vmem:[%s569_s1 + $0x28] sm:$0xff] }
   0x4   :  { %v54_v10 = vsel %vm26_vm0, %v42_v3, 0.0  ;;  %v48_v11 = vsel %vm26_vm0, %v40_v4, 0.0 }
   0x5   :  { %8 = vsyncpa [#allocation3], 0  ;;  %55 = vadd.xlane.f32.xlu1 %v54_v10  ;;  %49 = vadd.xlane.f32.xlu0 %v48_v11  ;;  %v57_v12 = vsel %vm26_vm0, %v43_v5, 0.0  ;;  %v51_v13 = vsel %vm26_vm0, %v41_v7, 0.0  ;;  %v45_v14 = vmul.f32 %v467_v8, %v467_v8  ;;  %v44_v15 = vmul.f32 %v472_v9, %v472_v9  ;;  %v485_v16 = vld [vmem:[%s569_s1 + $0x38] sm:$0xff]  ;;  %v490_v17 = vld [vmem:[%s569_s1 + $0x30] sm:$0xff] }
   0x6   :  { %v47_v20 = vmul.f32 %v485_v16, %v485_v16  ;;  %v46_v21 = vmul.f32 %v490_v17, %v490_v17  ;;  %v501_v22 = vld [vmem:[%s568_s0] sm:$0xff]  ;;  %v411_v27 = vmov 0.0|0.0   ;;  %vm412_vm1 = vmmov 0  }
   0x7   :  { %v63_v18 = vsel %vm26_vm0, %v45_v14, 0.0  ;;  %v60_v19 = vsel %vm26_vm0, %v44_v15, 0.0  ;;  %v25_v25 = vmul.f32 %v501_v22, %v501_v22  ;;  %326 = vmatprep.subr.bf16.mxu0 %v411_v27  ;;  %v413_v28 = vmov 0.0   ;;  %v24_v29 = vld [vmem:[%s570_s2] sm:$0xff]  ;;  %s415_s2 = smov [#allocation2]  }
   0x8   :  { %v69_v23 = vsel %vm26_vm0, %v47_v20, 0.0  ;;  %v66_v24 = vsel %vm26_vm0, %v46_v21, 0.0  ;;  %323 = vmatprep.mubr.msk.f32.mxu0 %vm412_vm1, %v413_v28  ;;  %v414_v30 = vmov 0   ;;  %s281_s30 = sshll.u32 %s415_s2, 4  ;;  %s282_s30 = int_to_ptr.vmem [resolvable:$true] %s281_s30 }
   0x9   :  { %58 = vadd.xlane.f32.xlu1 %v57_v12  ;;  %52 = vadd.xlane.f32.xlu0 %v51_v13  ;;  %v27_v26 = vsel %vm26_vm0, %v25_v25, 0.0  ;;  %s387_s4 = scalar_lea.vmem %s282_s30, 128  ;;  %p392_p1 = scmp.lt.s32.totalorder %s282_s30, %s282_s30 }
   0xa   :  { %347 = vset.pattern.permute.xlu1 %v414_v30  ;;  %348 = vset.pattern.permute.xlu0 %v414_v30  ;;  %p388_p0 = scmp.ne.s32.totalorder %s282_s30, %s387_s4  ;;  %p393_p2 = scmp.lt.s32.totalorder %s387_s4, %s387_s4 }
   0xc   :  { %p394_p3 = por %p393_p2, %p392_p1 }
   0xd   :  { %64 = vadd.xlane.f32.xlu1 %v63_v18  ;;  %61 = vadd.xlane.f32.xlu0 %v60_v19 }
   0xe   :  { %p395_p4 = pnand %p394_p3, %p388_p0 }
  0x11   :  { %70 = vadd.xlane.f32.xlu1 %v69_v23  ;;  %67 = vadd.xlane.f32.xlu0 %v66_v24 }
  0x15   :  { %28 = vadd.xlane.f32.xlu0 %v27_v26 }
  0x22   :  { %268 = vperm.xlu1 %347, %v24_v29  }
  0x92   :  { %v56_v31 = vpop.xlane.xlu1 %55  ;;  %v50_v32 = vpop.xlane.xlu0 %49 }
  0x93   :  { %349 = vrsqrt.f32 %v56_v31  ;;  %vm74_vm2 = vcmp.eq.f32.partialorder %v50_v32, inf  ;;  %v77_v42 = vand.u32 2147483648, %v50_v32  ;;  %vm76_vm3 = vcmp.eq.f32.partialorder %v50_v32, 0.0 }
  0x94   :  { %351 = vrsqrt.f32 %v50_v32  ;;  %vm88_vm4 = vcmp.eq.f32.partialorder %v56_v31, inf  ;;  %vm90_vm5 = vcmp.eq.f32.partialorder %v56_v31, 0.0  ;;  %v91_v58 = vand.u32 2147483648, %v56_v31 }
  0x96   :  { %v59_v33 = vpop.xlane.xlu1 %58  ;;  %v53_v34 = vpop.xlane.xlu0 %52 }
  0x97   :  { %353 = vrsqrt.f32 %v59_v33  ;;  %vm95_vm6 = vcmp.eq.f32.partialorder %v59_v33, inf  ;;  %v98_v52 = vand.u32 2147483648, %v59_v33  ;;  %vm81_vm7 = vcmp.eq.f32.partialorder %v53_v34, inf }
  0x98   :  { %355 = vrsqrt.f32 %v53_v34  ;;  %v84_v53 = vand.u32 2147483648, %v53_v34  ;;  %vm97_vm8 = vcmp.eq.f32.partialorder %v59_v33, 0.0  ;;  %vm83_vm9 = vcmp.eq.f32.partialorder %v53_v34, 0.0 }
  0x9a   :  { %v65_v35 = vpop.xlane.xlu1 %64  ;;  %v62_v36 = vpop.xlane.xlu0 %61 }
  0x9b   :  { %357 = vrsqrt.f32 %v65_v35  ;;  %vm109_vm10 = vcmp.eq.f32.partialorder %v65_v35, inf  ;;  %vm102_vm11 = vcmp.eq.f32.partialorder %v62_v36, inf  ;;  %v112_v5 = vand.u32 2147483648, %v65_v35 }
  0x9c   :  { %359 = vrsqrt.f32 %v62_v36  ;;  %vm111_vm12 = vcmp.eq.f32.partialorder %v65_v35, 0.0  ;;  %v105_v11 = vand.u32 2147483648, %v62_v36  ;;  %vm104_vm13 = vcmp.eq.f32.partialorder %v62_v36, 0.0 }
  0x9d   :  { %v350_v37 = vpop.eup %349 }
  0x9e   :  { %v352_v38 = vpop.eup %351  ;;  %v512_v39 = vpop.xlane.xlu1 %70  ;;  %v87_v44 = vmul.f32 %v350_v37, %v56_v31 }
  0x9f   :  { %v73_v40 = vmul.f32 %v352_v38, %v50_v32  ;;  %v514_v41 = vpop.xlane.xlu0 %67  ;;  %361 = vrsqrt.f32 %v512_v39  ;;  %vm123_vm14 = vcmp.eq.f32.partialorder %v512_v39, inf  ;;  %v126_v26 = vand.u32 2147483648, %v512_v39 }
  0xa0   :  { %363 = vrsqrt.f32 %v514_v41  ;;  %v89_v55 = vsel %vm88_vm4, %v56_v31, %v87_v44  ;;  %vm116_vm15 = vcmp.eq.f32.partialorder %v514_v41, inf  ;;  %vm125_vm1 = vcmp.eq.f32.partialorder %v512_v39, 0.0 }
  0xa1   :  { %v354_v43 = vpop.eup %353  ;;  %v75_v45 = vsel %vm74_vm2, %v50_v32, %v73_v40  ;;  %v92_v3 = vsel %vm90_vm5, %v91_v58, %v89_v55  ;;  %v119_v29 = vand.u32 2147483648, %v514_v41  ;;  %vm118_vm2 = vcmp.eq.f32.partialorder %v514_v41, 0.0 }
  0xa2   :  { %v356_v46 = vpop.eup %355  ;;  %v78_v47 = vsel %vm76_vm3, %v77_v42, %v75_v45  ;;  %v94_v48 = vmul.f32 %v354_v43, %v59_v33  ;;  %v130_v13 = vmax.f32 %v92_v3, 1e-12  ;;  %vm533_vm3 = vmpackc.low %vm26_vm0, %vm26_vm0 }
  0xa3   :  { %v128_v49 = vmax.f32 %v78_v47, 1e-12  ;;  %v80_v50 = vmul.f32 %v356_v46, %v53_v34  ;;  %v29_v7 = vpop.xlane.xlu0 %28 }
  0xa4   :  { %v96_v51 = vsel %vm95_vm6, %v59_v33, %v94_v48  ;;  %vm32_vm4 = vcmp.eq.f32.partialorder %v29_v7, inf  ;;  %v35_v44 = vand.u32 2147483648, %v29_v7  ;;  %vm34_vm5 = vcmp.eq.f32.partialorder %v29_v7, 0.0 }
  0xa5   :  { %v358_v54 = vpop.eup %357  ;;  %v82_v56 = vsel %vm81_vm7, %v53_v34, %v80_v50  ;;  %v99_v59 = vsel %vm97_vm8, %v98_v52, %v96_v51  ;;  %365 = vrcp.f32 %v128_v49 }
  0xa6   :  { %v360_v57 = vpop.eup %359  ;;  %v85_v60 = vsel %vm83_vm9, %v84_v53, %v82_v56  ;;  %v108_v61 = vmul.f32 %v358_v54, %v65_v35  ;;  %v131_v4 = vmax.f32 %v99_v59, 1e-12 }
  0xa7   :  { %v129_v62 = vmax.f32 %v85_v60, 1e-12  ;;  %v101_v63 = vmul.f32 %v360_v57, %v62_v36 }
  0xa8   :  { %v110_v10 = vsel %vm109_vm10, %v65_v35, %v108_v61 }
  0xa9   :  { %367 = vrcp.f32 %v129_v62  ;;  %v362_v12 = vpop.eup %361  ;;  %v103_v14 = vsel %vm102_vm11, %v62_v36, %v101_v63  ;;  %v113_v18 = vsel %vm111_vm12, %v112_v5, %v110_v10 }
  0xaa   :  { %v364_v15 = vpop.eup %363  ;;  %369 = vrsqrt.f32 %v29_v7  ;;  %v106_v19 = vsel %vm104_vm13, %v105_v11, %v103_v14  ;;  %v122_v20 = vmul.f32 %v362_v12, %v512_v39  ;;  %v133_v23 = vmax.f32 %v113_v18, 1e-12 }
  0xab   :  { %371 = vrcp.f32 %v131_v4  ;;  %v115_v21 = vmul.f32 %v364_v15, %v514_v41  ;;  %v132_v25 = vmax.f32 %v106_v19, 1e-12  ;;  %v269_v4 = vpop.permute.xlu1 %268 }
  0xac   :  { %373 = vrcp.f32 %v130_v13  ;;  %v124_v28 = vsel %vm123_vm14, %v512_v39, %v122_v20 }
  0xad   :  { %v117_v31 = vsel %vm116_vm15, %v514_v41, %v115_v21  ;;  %375 = vrcp.f32 %v133_v23  ;;  %v127_v34 = vsel %vm125_vm1, %v126_v26, %v124_v28 }
  0xae   :  { %377 = vrcp.f32 %v132_v25  ;;  %v120_v37 = vsel %vm118_vm2, %v119_v29, %v117_v31  ;;  %v135_v40 = vmax.f32 %v127_v34, 1e-12 }
  0xaf   :  { %v366_v24 = vpop.eup %365 }
  0xb0   :  { %v137_v32 = vmul.f32 %v366_v24, %v444_v1  ;;  %v134_v1 = vmax.f32 %v120_v37, 1e-12  ;;  %379 = vrcp.f32 %v135_v40 }
  0xb2   :  { %381 = vrcp.f32 %v134_v1 }
  0xb3   :  { %v368_v30 = vpop.eup %367 }
  0xb4   :  { %v139_v33 = vmul.f32 %v368_v30, %v460_v6  ;;  %v370_v36 = vpop.eup %369 }
  0xb5   :  { %v372_v39 = vpop.eup %371  ;;  %v31_v6 = vmul.f32 %v370_v36, %v29_v7 }
  0xb6   :  { %v327_v38 = vpack.c.bf16 %v139_v33, %v137_v32  ;;  %v374_v41 = vpop.eup %373  ;;  %v143_v42 = vmul.f32 %v372_v39, %v449_v2 }
  0xb7   :  { %v141_v43 = vmul.f32 %v374_v41, %v439_v0  ;;  %v376_v45 = vpop.eup %375  ;;  %v33_v46 = vsel %vm32_vm4, %v29_v7, %v31_v6 }
  0xb8   :  { %329 = vmatpush3.bf16.xpose.msk.msra.mxu0 %vm533_vm3, %v327_v38  ;;  %v378_v48 = vpop.eup %377  ;;  %v36_v49 = vsel %vm34_vm5, %v35_v44, %v33_v46  ;;  %v147_v2 = vmul.f32 %v376_v45, %v467_v8 }
  0xb9   :  { %330 = vmatprep.subr.bf16.mxu0 %v411_v27  ;;  %v331_v47 = vpack.c.bf16 %v143_v42, %v141_v43  ;;  %v145_v50 = vmul.f32 %v378_v48, %v472_v9  ;;  %v37_v51 = vmax.f32 %v36_v49, 1e-12 }
  0xba   :  { %v380_v52 = vpop.eup %379 }
  0xbb   :  { %v335_v0 = vpack.c.bf16 %v147_v2, %v145_v50  ;;  %383 = vrcp.f32 %v37_v51  ;;  %v151_v55 = vmul.f32 %v380_v52, %v485_v16 }
  0xbc   :  { %v382_v53 = vpop.eup %381 }
  0xbd   :  { %v149_v54 = vmul.f32 %v382_v53, %v490_v17 }
  0xbf   :  { %v339_v56 = vpack.c.bf16 %v151_v55, %v149_v54 }
  0xc0   :  { %333 = vmatpush3.bf16.xpose.msk.msra.mxu0 %vm533_vm3, %v331_v47 }
  0xc1   :  { %334 = vmatprep.subr.bf16.mxu0 %v411_v27 }
  0xc5   :  { %v384_v9 = vpop.eup %383 }
  0xc6   :  { %v39_v8 = vmul.f32 %v384_v9, %v501_v22 }
  0xc8   :  { %337 = vmatpush3.bf16.xpose.msk.msra.mxu0 %vm533_vm3, %v335_v0 }
  0xc9   :  { %338 = vmatprep.subr.bf16.mxu0 %v411_v27  ;;  %v262_v27 = vlaneseq }
  0xcb   :  { %v263_v63 = vand.u32 127, %v262_v27 }
  0xcd   :  { %vm270_vm8 = vcmp.eq.s32.totalorder %v263_v63, %v269_v4 }
  0xd0   :  { %341 = vmatpush3.bf16.xpose.msk.msra.mxu0 %vm533_vm3, %v339_v56 }
  0xd7   :  { %324 = vmatmul.mubr.msk.f32.vlgmr.msra.gmra.mrb[0].mxu0 %vm26_vm0, %v39_v8  ;;  %vm273_vm0 = vcmask 523264  }
 0x1aa   :  { %v245_v57 = vpop.f32.mrb[0].mxu0 }
 0x1ab   :  { %v249_v58 = vmul.f32 %v245_v57, %v245_v57  ;;  %v325_v59 = vpop.f32.mrb[1].mxu0  ;;  %v259_v7 = vmul.f32 0.87758255, %v245_v57 }
 0x1ad   :  { %v250_v60 = vsub.f32 1.0, %v249_v58 }
 0x1af   :  { %v251_v61 = vmax.f32 %v250_v60, 0.0 }
 0x1b1   :  { %385 = vrsqrt.f32 %v251_v61  ;;  %vm254_vm6 = vcmp.eq.f32.partialorder %v251_v61, inf  ;;  %v257_v16 = vand.u32 2147483648, %v251_v61  ;;  %vm256_vm7 = vcmp.eq.f32.partialorder %v251_v61, 0.0 }
 0x1bb   :  { %v386_v62 = vpop.eup %385 }
 0x1bc   :  { %v253_v17 = vmul.f32 %v386_v62, %v251_v61 }
 0x1be   :  { %v255_v3 = vsel %vm254_vm6, %v251_v61, %v253_v17 }
 0x1bf   :  { %v258_v5 = vsel %vm256_vm7, %v257_v16, %v255_v3 }
 0x1c0   :  { %v260_v22 = vmul.f32 0.47942555, %v258_v5 }
 0x1c2   :  { %v261_v10 = vsub.f32 %v259_v7, %v260_v22 }
 0x1c4   :  { %v271_v11 = vsel %vm270_vm8, %v261_v10, %v245_v57 }
 0x1c5   :  { %v272_v12 = vmul.f32 30.0, %v271_v11 }
 0x1c7   :  { %274 = vst.msk [vmem:[#allocation2] sm:$0xff] %vm273_vm0, %v272_v12 }
 0x1c8   :  { %398 = shalt.err (!%p395_p4)
}
 0x1c9   :  { %s399_s7 = scalar_lea.hbm %s571_s3, 128 }
 0x1ca   :  { %p400_p5 = scmp.ne.s32.totalorder %s571_s3, %s399_s7  ;;  %p403_p6 = scmp.lt.u32.totalorder %s399_s7, %s571_s3 }
 0x1cc   :  { %p405_p7 = pnand %p403_p6, %p400_p5 }
 0x1ce   :  { %408 = shalt.err (!%p405_p7)
}
 0x1cf   :  { %284 = dma.vmem_to_hbm [thread:$0]  %s282_s30, 128, %s571_s3, [#allocation3]  }
 0x1d0   :  { %409 = dma.done.wait [#allocation3], 128  }
 0x1d1   :  { %410 = vsyncadd [#allocation3], 4294967168 }
 0x1d2   :  { %288 = vsyncpa [#allocation3], 1 }

</bundles_post_ra>
